<compile_context>
chip_gen: v6e
topology: v6e:2x2x1
jax: 0.10.0
libtpu: 0.0.40
codegen_flags: <defaults>
</compile_context>

<pallas_src>
import functools

import jax
import jax.numpy as jnp
from jax.experimental import pallas as pl
from jax.experimental.pallas import tpu as pltpu

_LANES = 128
_ROW_ALIGN = 16          # multiple of both the f32 (8) and bf16 (16) sublane tiles


def _pred_loss_xla(pred_out, pred_gt):
    """Plain-XLA implementation (fallback for tiny inputs; also the reference)."""
    gt2 = jnp.reshape(pred_gt, (-1, 2)).astype(jnp.float32)
    pr2 = jnp.reshape(pred_out, (-1, 2)).astype(jnp.float32)
    mask = gt2[:, 0] != 0.0
    d = gt2 - pr2
    norm = jnp.sqrt(jnp.sum(d * d, axis=1))
    return {
        "reg_loss": jnp.sum(jnp.where(mask, norm, 0.0)),
        "reg_loss_cnt": jnp.sum(mask.astype(jnp.int32)),
    }


@functools.partial(jax.jit, static_argnames=("block_rows", "n_split"))
def pred_loss(pred_out, pred_gt, *, block_rows=8192, n_split=2):
    """Pallas implementation of PredLoss.forward.  Returns a dict of scalars."""
    common = jnp.promote_types(pred_out.dtype, pred_gt.dtype)
    work_dtype = jnp.bfloat16 if common == jnp.dtype(jnp.bfloat16) else jnp.float32

    gt = jnp.ravel(pred_gt).astype(work_dtype)   # [x0,y0,x1,y1,...]; layout-free
    pr = jnp.ravel(pred_out).astype(work_dtype)
    total = gt.shape[0]

    rem = total % _LANES
    if rem:
        # Uncommon case (point count not a multiple of 64): pad only to the next
        # 128 boundary.  Padded gt_x == 0 pairs are excluded by the kernel.
        gt = jnp.pad(gt, (0, _LANES - rem))
        pr = jnp.pad(pr, (0, _LANES - rem))
    rows = gt.shape[0] // _LANES

    if rows < _ROW_ALIGN:
        # Too small for a (16, 128) tile — a fused XLA reduction wins anyway.
        return _pred_loss_xla(pred_out, pred_gt)

    gt2d = gt.reshape(rows, _LANES)              # bitcast reshape, no HBM copy
    pr2d = pr.reshape(rows, _LANES)

    block_rows = max(_ROW_ALIGN, (block_rows // _ROW_ALIGN) * _ROW_ALIGN)
    tr = min(block_rows, (rows // _ROW_ALIGN) * _ROW_ALIGN)
    nblocks = pl.cdiv(rows, tr)
    n_split_eff = max(1, min(n_split, nblocks))
    steps = pl.cdiv(nblocks, n_split_eff)

    def kernel(gt_ref, pr_ref, loss_ref, cnt_ref):
        j = pl.program_id(1)                      # reduction ("arbitrary") axis

        @pl.when(j == 0)
        def _init():
            loss_ref[...] = jnp.zeros_like(loss_ref)
            cnt_ref[...] = jnp.zeros_like(cnt_ref)

        blk = gt_ref.shape[0]                     # == tr (static)
        gt_t = gt_ref[...].astype(jnp.float32)    # (tr, 128), interleaved x,y,...
        pr_t = pr_ref[...].astype(jnp.float32)
        d = gt_t - pr_t
        sq = d * d

        # Lane parity: even lanes hold x, odd lanes hold y of each (x, y) pair.
        lane1 = jax.lax.broadcasted_iota(jnp.int32, (1, _LANES), 1)
        is_even = (lane1 & 1) == 0                # (1, 128), broadcasts over rows

        # Roll-convention probe on a single (8,128) vreg: under the np.roll
        # convention roll(+1) brings lane i-1 into lane i, so the pair sum below
        # lands on the ODD lane; under the reversed convention on the EVEN lane.
        lane8 = jax.lax.broadcasted_iota(jnp.int32, (8, _LANES), 1)
        conv_np = pltpu.roll(lane8, shift=1, axis=1) == (
            (lane8 + _LANES - 1) & (_LANES - 1))
        pair_lane8 = ((lane8 & 1) == 1) == conv_np            # (8, 128)

        # Rows at/after `rows` (partial trailing block or a clamped fully
        # out-of-range block) hold garbage.  Poison the x lane of every invalid
        # pair (gt_x == 0 or out-of-bounds row) to -inf: under either roll
        # convention the x lane participates in its own pair's sum, so the pair
        # can never pass the >= 0 validity test.
        b = pl.program_id(0) * pl.num_programs(1) + j         # logical block id
        row = jax.lax.broadcasted_iota(jnp.int32, (blk, _LANES), 0)
        in_bounds = row < (rows - b * blk)
        x_valid = (gt_t != 0.0) & in_bounds
        g = jnp.where(is_even & ~x_valid, -jnp.inf, sq)

        # Single full-tile lane roll (XLU, an otherwise idle unit).
        pair = g + pltpu.roll(g, shift=1, axis=1)             # dx^2 + dy^2
        pair3 = pair.reshape(blk // 8, 8, _LANES)
        valid3 = (pair3 >= 0.0) & pair_lane8
        contrib3 = jnp.where(valid3, jnp.sqrt(pair3), 0.0)

        # Reduce across vregs only (leading axis); keep lane/sublane-dense
        # (8, 128) f32 partials resident in the output accumulator blocks.
        loss_ref[...] += jnp.sum(contrib3, axis=0)[None]
        cnt_ref[...] += jnp.sum(valid3.astype(jnp.float32), axis=0)[None]

    # Clamp logical block ids past the end of the array onto the last real
    # block; their contributions are fully masked out by `in_bounds` above.
    idx_map = lambda i, j: (jnp.minimum(i * steps + j, nblocks - 1), 0)
    itemsize = jnp.dtype(work_dtype).itemsize

    loss_part, cnt_part = pl.pallas_call(
        kernel,
        out_shape=(
            jax.ShapeDtypeStruct((n_split_eff, 8, _LANES), jnp.float32),
            jax.ShapeDtypeStruct((n_split_eff, 8, _LANES), jnp.float32),
        ),
        grid=(n_split_eff, steps),
        in_specs=[
            pl.BlockSpec((tr, _LANES), idx_map),
            pl.BlockSpec((tr, _LANES), idx_map),
        ],
        out_specs=(
            pl.BlockSpec((1, 8, _LANES), lambda i, j: (i, 0, 0)),
            pl.BlockSpec((1, 8, _LANES), lambda i, j: (i, 0, 0)),
        ),
        compiler_params=pltpu.CompilerParams(
            dimension_semantics=("parallel", "arbitrary"),
            vmem_limit_bytes=32 * 1024 * 1024,
        ),
        cost_estimate=pl.CostEstimate(
            flops=8 * rows * _LANES,
            transcendentals=rows * (_LANES // 2),
            bytes_accessed=2 * rows * _LANES * itemsize
            + 2 * n_split_eff * 8 * _LANES * 4,
        ),
    )(gt2d, pr2d)

    return {
        "reg_loss": jnp.sum(loss_part),
        # Each lane/sublane bucket holds an exact small integer in f32; cast per
        # bucket and integer-sum for an exact count.
        "reg_loss_cnt": jnp.sum(cnt_part.astype(jnp.int32)),
    }


def _check(pred_out, pred_gt, **kw):
    out = pred_loss(pred_out, pred_gt, **kw)
    jax.block_until_ready(out["reg_loss"])
    jax.block_until_ready(out["reg_loss_cnt"])
    ref = _pred_loss_xla(pred_out, pred_gt)
    assert jnp.allclose(out["reg_loss"], ref["reg_loss"], rtol=1e-4, atol=1e-4), (
        out["reg_loss"], ref["reg_loss"])
    assert int(out["reg_loss_cnt"]) == int(ref["reg_loss_cnt"]), (
        out["reg_loss_cnt"], ref["reg_loss_cnt"])
    return out


if __name__ == "__main__":
    # PredLoss has no learnable parameters (config is unused in forward).
    key = jax.random.PRNGKey(0)
    k1, k2, k3, k4, k5, k6 = jax.random.split(key, 6)

    # (batch, agents, pred_len, 2): 2*21*64*2 = 5376 flat values = 42 rows of
    # 128 lanes.  With block_rows=16 / n_split=2 this exercises the multi-step
    # grid, the 2-way parallel split, a partial trailing block (garbage rows
    # masked in-kernel) and a clamped fully out-of-range block.
    B, A, T = 2, 21, 64
    pred_out = jax.random.normal(k1, (B, A, T, 2), dtype=jnp.float32)
    pred_gt = jax.random.normal(k2, (B, A, T, 2), dtype=jnp.float32)
    drop = jax.random.bernoulli(k3, p=0.3, shape=(B, A, T))
    pred_gt = pred_gt.at[..., 0].set(jnp.where(drop, 0.0, pred_gt[..., 0]))
    _check(pred_out, pred_gt, block_rows=16, n_split=2)

    # Flat length not a multiple of 128 (2*3*180*2 = 2160): exercises the small
    # 128-boundary pad fallback plus the partial-block row mask.
    B2, A2, T2 = 2, 3, 180
    po2 = jax.random.normal(k4, (B2, A2, T2, 2), dtype=jnp.float32)
    pg2 = jax.random.normal(k5, (B2, A2, T2, 2), dtype=jnp.float32)
    drop2 = jax.random.bernoulli(k6, p=0.5, shape=(B2, A2, T2))
    pg2 = pg2.at[..., 0].set(jnp.where(drop2, 0.0, pg2[..., 0]))
    _check(po2, pg2, block_rows=16, n_split=2)

    print("KERNEL_OK")
</pallas_src>

<mosaic_0001>
module attributes {stable_mosaic.version = 11 : i64} {
  func.func @kernel(%arg0: i32, %arg1: i32, %arg2: memref<16x128xf32, #tpu.memory_space<vmem>>, %arg3: memref<16x128xf32, #tpu.memory_space<vmem>>, %arg4: memref<1x8x128xf32, #tpu.memory_space<vmem>>, %arg5: memref<1x8x128xf32, #tpu.memory_space<vmem>>) attributes {dimension_semantics = [#tpu.dimension_semantics<parallel>, #tpu.dimension_semantics<arbitrary>], iteration_bounds = array<i64: 2, 2>, scalar_prefetch = 0 : i64, scratch_operands = 0 : i64, tpu.core_type = #tpu.core_type<tc>, window_params = [{transform_indices = @transform_0, window_bounds = array<i64: 16, 128>}, {transform_indices = @transform_1, window_bounds = array<i64: 16, 128>}, {transform_indices = @transform_2, window_bounds = array<i64: 1, 8, 128>}, {transform_indices = @transform_3, window_bounds = array<i64: 1, 8, 128>}]} {
    %c0_i32 = arith.constant 0 : i32
    %0 = arith.cmpi eq, %arg1, %c0_i32 : i32
    %1 = arith.extui %0 : i1 to i32
    %c0_i32_0 = arith.constant 0 : i32
    %2 = arith.cmpi ne, %1, %c0_i32_0 : i32
    scf.if %2 {
      %cst_29 = arith.constant 0.000000e+00 : f32
      %65 = vector.broadcast %cst_29 : f32 to vector<1x8x128xf32>
      %c0_30 = arith.constant 0 : index
      %c0_31 = arith.constant 0 : index
      %c0_32 = arith.constant 0 : index
      %66 = vector.load %arg4[%c0_30, %c0_31, %c0_32] : memref<1x8x128xf32, #tpu.memory_space<vmem>>, vector<1x8x128xf32>
      tpu.vector_store %arg4[%c0_30, %c0_31, %c0_32], %65 {strides = array<i32>} : memref<1x8x128xf32, #tpu.memory_space<vmem>>, vector<1x8x128xf32>,
      %cst_33 = arith.constant 0.000000e+00 : f32
      %67 = vector.broadcast %cst_33 : f32 to vector<1x8x128xf32>
      %c0_34 = arith.constant 0 : index
      %c0_35 = arith.constant 0 : index
      %c0_36 = arith.constant 0 : index
      %68 = vector.load %arg5[%c0_34, %c0_35, %c0_36] : memref<1x8x128xf32, #tpu.memory_space<vmem>>, vector<1x8x128xf32>
      tpu.vector_store %arg5[%c0_34, %c0_35, %c0_36], %67 {strides = array<i32>} : memref<1x8x128xf32, #tpu.memory_space<vmem>>, vector<1x8x128xf32>,
    } else {
    }
    %c0 = arith.constant 0 : index
    %c0_1 = arith.constant 0 : index
    %3 = vector.load %arg2[%c0, %c0_1] : memref<16x128xf32, #tpu.memory_space<vmem>>, vector<16x128xf32>
    %c0_2 = arith.constant 0 : index
    %c0_3 = arith.constant 0 : index
    %4 = vector.load %arg3[%c0_2, %c0_3] : memref<16x128xf32, #tpu.memory_space<vmem>>, vector<16x128xf32>
    %5 = arith.subf %3, %4 : vector<16x128xf32>
    %6 = arith.mulf %5, %5 : vector<16x128xf32>
    %7 = tpu.iota {dimensions = array<i32: 1>} : vector<1x128xi32>
    %c1_i32 = arith.constant 1 : i32
    %8 = vector.broadcast %c1_i32 : i32 to vector<1x128xi32>
    %9 = arith.andi %7, %8 : vector<1x128xi32>
    %c0_i32_4 = arith.constant 0 : i32
    %10 = vector.broadcast %c0_i32_4 : i32 to vector<1x128xi32>
    %11 = arith.cmpi eq, %9, %10 : vector<1x128xi32>
    %12 = tpu.iota {dimensions = array<i32: 1>} : vector<8x128xi32>
    %c1_i32_5 = arith.constant 1 : i32
    %13 = tpu.dynamic_rotate %12 by %c1_i32_5 dim 1 : vector<8x128xi32>, i32 -> vector<8x128xi32>
    %c128_i32 = arith.constant 128 : i32
    %14 = vector.broadcast %c128_i32 : i32 to vector<8x128xi32>
    %15 = arith.addi %12, %14 : vector<8x128xi32>
    %c1_i32_6 = arith.constant 1 : i32
    %16 = vector.broadcast %c1_i32_6 : i32 to vector<8x128xi32>
    %17 = arith.subi %15, %16 : vector<8x128xi32>
    %c127_i32 = arith.constant 127 : i32
    %18 = vector.broadcast %c127_i32 : i32 to vector<8x128xi32>
    %19 = arith.andi %17, %18 : vector<8x128xi32>
    %20 = arith.cmpi eq, %13, %19 : vector<8x128xi32>
    %c1_i32_7 = arith.constant 1 : i32
    %21 = vector.broadcast %c1_i32_7 : i32 to vector<8x128xi32>
    %22 = arith.andi %12, %21 : vector<8x128xi32>
    %c1_i32_8 = arith.constant 1 : i32
    %23 = vector.broadcast %c1_i32_8 : i32 to vector<8x128xi32>
    %24 = arith.cmpi eq, %22, %23 : vector<8x128xi32>
    %25 = arith.xori %24, %20 : vector<8x128xi1>
    %cst = arith.constant dense<true> : vector<8x128xi1>
    %26 = arith.xori %25, %cst : vector<8x128xi1>
    %c2_i32 = arith.constant 2 : i32
    %27 = arith.muli %arg0, %c2_i32 : i32
    %28 = arith.addi %27, %arg1 : i32
    %29 = tpu.iota {dimensions = array<i32: 0>} : vector<16x128xi32>
    %c16_i32 = arith.constant 16 : i32
    %30 = arith.muli %28, %c16_i32 : i32
    %c42_i32 = arith.constant 42 : i32
    %31 = arith.subi %c42_i32, %30 : i32
    %32 = vector.broadcast %31 : i32 to vector<16x128xi32>
    %33 = arith.cmpi slt, %29, %32 : vector<16x128xi32>
    %cst_9 = arith.constant 0.000000e+00 : f32
    %34 = vector.broadcast %cst_9 : f32 to vector<16x128xf32>
    %35 = arith.cmpf one, %3, %34 : vector<16x128xf32>
    %36 = arith.andi %35, %33 : vector<16x128xi1>
    %cst_10 = arith.constant dense<true> : vector<16x128xi1>
    %37 = arith.xori %36, %cst_10 : vector<16x128xi1>
    %38 = vector.broadcast %11 : vector<1x128xi1> to vector<16x128xi1>
    %39 = arith.andi %38, %37 : vector<16x128xi1>
    %cst_11 = arith.constant 0xFF800000 : f32
    %40 = vector.broadcast %cst_11 : f32 to vector<16x128xf32>
    %41 = arith.select %39, %40, %6 : vector<16x128xi1>, vector<16x128xf32>
    %c1_i32_12 = arith.constant 1 : i32
    %42 = tpu.dynamic_rotate %41 by %c1_i32_12 dim 1 : vector<16x128xf32>, i32 -> vector<16x128xf32>
    %43 = arith.addf %41, %42 : vector<16x128xf32>
    %44 = vector.shape_cast %43 : vector<16x128xf32> to vector<2x8x128xf32>
    %cst_13 = arith.constant 0.000000e+00 : f32
    %45 = vector.broadcast %cst_13 : f32 to vector<2x8x128xf32>
    %46 = arith.cmpf oge, %44, %45 : vector<2x8x128xf32>
    %47 = vector.shape_cast %26 : vector<8x128xi1> to vector<1x8x128xi1>
    %48 = vector.broadcast %47 : vector<1x8x128xi1> to vector<2x8x128xi1>
    %49 = arith.andi %46, %48 : vector<2x8x128xi1>
    %50 = math.sqrt %44 : vector<2x8x128xf32>
    %cst_14 = arith.constant 0.000000e+00 : f32
    %51 = vector.broadcast %cst_14 : f32 to vector<2x8x128xf32>
    %52 = arith.select %49, %50, %51 : vector<2x8x128xi1>, vector<2x8x128xf32>
    %c0_15 = arith.constant 0 : index
    %c0_16 = arith.constant 0 : index
    %c0_17 = arith.constant 0 : index
    %53 = vector.load %arg4[%c0_15, %c0_16, %c0_17] : memref<1x8x128xf32, #tpu.memory_space<vmem>>, vector<1x8x128xf32>
    %cst_18 = arith.constant dense<0.000000e+00> : vector<8x128xf32>
    %54 = vector.multi_reduction <add>, %52, %cst_18 [0] : vector<2x8x128xf32> to vector<8x128xf32>
    %55 = vector.shape_cast %54 : vector<8x128xf32> to vector<1x8x128xf32>
    %56 = arith.addf %53, %55 : vector<1x8x128xf32>
    %c0_19 = arith.constant 0 : index
    %c0_20 = arith.constant 0 : index
    %c0_21 = arith.constant 0 : index
    %57 = vector.load %arg4[%c0_19, %c0_20, %c0_21] : memref<1x8x128xf32, #tpu.memory_space<vmem>>, vector<1x8x128xf32>
    tpu.vector_store %arg4[%c0_19, %c0_20, %c0_21], %56 {strides = array<i32>} : memref<1x8x128xf32, #tpu.memory_space<vmem>>, vector<1x8x128xf32>,
    %c0_22 = arith.constant 0 : index
    %c0_23 = arith.constant 0 : index
    %c0_24 = arith.constant 0 : index
    %58 = vector.load %arg5[%c0_22, %c0_23, %c0_24] : memref<1x8x128xf32, #tpu.memory_space<vmem>>, vector<1x8x128xf32>
    %59 = arith.extui %49 : vector<2x8x128xi1> to vector<2x8x128xi32>
    %60 = arith.sitofp %59 : vector<2x8x128xi32> to vector<2x8x128xf32>
    %cst_25 = arith.constant dense<0.000000e+00> : vector<8x128xf32>
    %61 = vector.multi_reduction <add>, %60, %cst_25 [0] : vector<2x8x128xf32> to vector<8x128xf32>
    %62 = vector.shape_cast %61 : vector<8x128xf32> to vector<1x8x128xf32>
    %63 = arith.addf %58, %62 : vector<1x8x128xf32>
    %c0_26 = arith.constant 0 : index
    %c0_27 = arith.constant 0 : index
    %c0_28 = arith.constant 0 : index
    %64 = vector.load %arg5[%c0_26, %c0_27, %c0_28] : memref<1x8x128xf32, #tpu.memory_space<vmem>>, vector<1x8x128xf32>
    tpu.vector_store %arg5[%c0_26, %c0_27, %c0_28], %63 {strides = array<i32>} : memref<1x8x128xf32, #tpu.memory_space<vmem>>, vector<1x8x128xf32>,
    return
  }
  func.func @transform_0(%arg0: i32, %arg1: i32) -> (i32, i32) {
    %c2_i32 = arith.constant 2 : i32
    %0 = arith.muli %arg0, %c2_i32 : i32
    %1 = arith.addi %0, %arg1 : i32
    %c2_i32_0 = arith.constant 2 : i32
    %2 = arith.minsi %1, %c2_i32_0 : i32
    %c0_i32 = arith.constant 0 : i32
    %c0_i32_1 = arith.constant 0 : i32
    return %2, %c0_i32 : i32, i32
  }
  func.func @transform_1(%arg0: i32, %arg1: i32) -> (i32, i32) {
    %c2_i32 = arith.constant 2 : i32
    %0 = arith.muli %arg0, %c2_i32 : i32
    %1 = arith.addi %0, %arg1 : i32
    %c2_i32_0 = arith.constant 2 : i32
    %2 = arith.minsi %1, %c2_i32_0 : i32
    %c0_i32 = arith.constant 0 : i32
    %c0_i32_1 = arith.constant 0 : i32
    return %2, %c0_i32 : i32, i32
  }
  func.func @transform_2(%arg0: i32, %arg1: i32) -> (i32, i32, i32) {
    %c0_i32 = arith.constant 0 : i32
    %c0_i32_0 = arith.constant 0 : i32
    %c0_i32_1 = arith.constant 0 : i32
    return %arg0, %c0_i32, %c0_i32_0 : i32, i32, i32
  }
  func.func @transform_3(%arg0: i32, %arg1: i32) -> (i32, i32, i32) {
    %c0_i32 = arith.constant 0 : i32
    %c0_i32_0 = arith.constant 0 : i32
    %c0_i32_1 = arith.constant 0 : i32
    return %arg0, %c0_i32, %c0_i32_0 : i32, i32, i32
  }
}

</mosaic_0001>

<bundles_post_ra>
// kernel: pred_loss.1
= control target key start
LH: loop header
LB: loop body
LE: loop exit
PB: predicated region body
PF: predicated region fallthrough
CT: control target
= control target key end

     0   :  { %s605_s12 = smov 0   ;;  %s607_s13 = smov 0   ;;  %s695_s0 = inlined_call_operand.vmem [shape: f32[42,128], index: 0, kind: input, shape index: {}]   ;;  %s696_s1 = inlined_call_operand.vmem [shape: f32[42,128], index: 1, kind: input, shape index: {}]   ;;  %s697_s2 = inlined_call_operand.vmem [shape: f32[2,8,128], index: 2, kind: output, shape index: {0}]   ;;  %s698_s3 = inlined_call_operand.vmem [shape: f32[2,8,128], index: 3, kind: output, shape index: {1}]  }
   0x1   :  { %s609_s14 = smov 0   ;;  %s611_s15 = smov 0  }
   0x2   :  { %s613_s16 = smov 0  }
   0x3 LB: > { %s23_s17 = sadd.s32 1, %s571_s14  ;;  %s26_s18 = sadd.s32 1, %s575_s15  ;;  %s579_s16 = sphi %s613_s16, %s14_s16   ;;  %s575_s15 = sphi %s611_s15, %s706_s15   ;;  %s571_s14 = sphi %s609_s14, %s705_s14   ;;  %s567_s13 = sphi %s607_s13, %s704_s13   ;;  %s563_s12 = sphi %s605_s12, %s703_s12  }
   0x4   : > { %p24_p0 = scmp.ge.s32.totalorder %s23_s17, 2  ;;  %p476_p1 = scmp.ge.s32.totalorder %s579_s16, 1 }
   0x5   : > { %p196_p2 = scmp.lt.s32.totalorder %s579_s16, 5 }
   0x6   : > { %s708_s17 = smov (%p24_p0, %s23_s17), 0  ;;  %s710_s18 = smov (!%p24_p0, %s26_s18), %s575_s15 }
   0x7   : > { %p197_p3 = pnand %p476_p1, %p196_p2  ;;  %p28_p4 = scmp.ge.s32.totalorder %s710_s18, 2 }
   0x8   : > { %s477_s19 = sshll.u32 (!%p197_p3), %s567_s13, 1  ;;  %p264_p5 = scmp.lt.s32.totalorder (!%p197_p3), %s567_s13, 1 }
   0x9   : > { %s712_s18 = smov (%p28_p4, %s710_s18), 0  ;;  %200 = sbr.rel (%p197_p3) target bundleno = 180 (0xb4), region = 28 }
   0xa   : > { %s237_s20 = sadd.s32 (!%p197_p3), %s563_s12, %s477_s19  ;;  %p485_p8 = scmp.ne.s32.totalorder (!%p197_p3), %s563_s12, 0 }
   0xb   : > { %p238_p6 = scmp.lt.s32.totalorder (!%p197_p3), %s237_s20, 2 }
   0xe   : > { %s714_s13 = smov (!%p264_p5, %s567_s13), 1 }
   0xf   : > { %s239_s21 = scalar_select %p238_p6, %s237_s20, 2 }
  0x10   : > { %s483_s22 = sshll.u32 %s714_s13, 3 }
  0x11   : > { %s478_s23 = sshll.u32 %s239_s21, 1  ;;  %s641_s26 = scalar_lea.vmem %s697_s2, %s483_s22 }
  0x12   : > { %p241_p7 = scmp.lt.s32.totalorder %s478_s23, 5  ;;  %s646_s29 = scalar_lea.vmem %s698_s3, %s483_s22 }
  0x13   : > { %275 = sbr.rel (%p485_p8) target bundleno = 26 (0x1a), region = 32 }
  0x14   : > { %s716_s23 = smov (!%p241_p7, %s478_s23), 5 }
  0x15   : > { %s479_s30 = sshll.u32 %s716_s23, 3 }
  0x16   : > { %s244_s6 = scalar_lea.vmem %s695_s0, %s479_s30  ;;  %s258_s9 = scalar_lea.vmem %s696_s1, %s479_s30 }
  0x18   : > { %v581_v0 = vmov 0.0  }
  0x19   : > { %276 = vst [vmem:[%s641_s26] sm:$0xff] %v581_v0  ;;  %277 = vst [vmem:[%s646_s29] sm:$0xff] %v581_v0 }
  0x1a PF: > { %v286_v1 = vlaneseq  ;;  %v278_v2 = vld [vmem:[%s244_s6] sm:$0xff]  ;;  %s488_s10 = sshll.u32 %s237_s20, 4  ;;  %v279_v4 = vld [vmem:[%s244_s6 + $0x8] sm:$0xff]  ;;  %s582_s12 = smov 1   ;;  %vm583_vm5 = vmmov 1   ;;  %v584_v27 = vmov 0.0  }
  0x1b   : > { %v280_v3 = vld [vmem:[%s258_s9] sm:$0xff]  ;;  %s305_s11 = ssub.s32 42, %s488_s10  ;;  %v281_v6 = vld [vmem:[%s258_s9 + $0x8] sm:$0xff]  ;;  %vm309_vm0 = vcmp.ne.f32.partialorder %v278_v2, 0.0  ;;  %vm310_vm3 = vcmp.ne.f32.partialorder %v279_v4, 0.0 }
  0x1c   : > { %v282_v5 = vsub.f32 %v278_v2, %v280_v3  ;;  %v287_v7 = vand.u32 127, %v286_v1  ;;  %v302_v8 = vshrl.u32 %v286_v1, 7  ;;  %v306_v9 = vstv %s305_s11 }
  0x1d   : > { %v283_v10 = vsub.f32 %v279_v4, %v281_v6 }
  0x1e   : > { %290 = vrot.lane.b32.xlu1 %v287_v7, %s582_s12  ;;  %v284_v11 = vmul.f32 %v282_v5, %v282_v5  ;;  %v288_v12 = vand.u32 1, %v287_v7  ;;  %vm307_vm1 = vcmp.lt.s32.totalorder %v302_v8, %v306_v9  ;;  %v303_v13 = vadd.s32 8, %v302_v8 }
  0x1f   : > { %vm311_vm2 = vmand %vm309_vm0, %vm307_vm1  ;;  %v285_v14 = vmul.f32 %v283_v10, %v283_v10  ;;  %v292_v17 = vadd.s32 128, %v287_v7 }
  0x20   : > { %vm289_vm4 = vcmp.eq.s32.totalorder %v288_v12, 0  ;;  %vm313_vm6 = vmxor %vm311_vm2, %vm583_vm5  ;;  %vm308_vm7 = vcmp.lt.s32.totalorder %v303_v13, %v306_v9  ;;  %vm296_vm12 = vcmp.eq.s32.totalorder %v288_v12, 1  ;;  %v353_v29 = vld [vmem:[%s646_s29] sm:$0xff] }
  0x21   : > { %vm317_vm8 = vmand %vm289_vm4, %vm313_vm6  ;;  %v486_v18 = vadd.s32 4294967295, %v292_v17  ;;  %v349_v44 = vld [vmem:[%s641_s26] sm:$0xff] }
  0x22   : > { %v319_v15 = vsel %vm317_vm8, -inf, %v284_v11  ;;  %vm312_vm9 = vmand %vm310_vm3, %vm308_vm7 }
  0x23   : > { %321 = vrot.lane.b32.xlu0 %v319_v15, %s582_s12  ;;  %vm314_vm10 = vmxor %vm312_vm9, %vm583_vm5  ;;  %v294_v19 = vand.u32 127, %v486_v18 }
  0x24   : > { %vm318_vm11 = vmand %vm289_vm4, %vm314_vm10 }
  0x25   : > { %v320_v16 = vsel %vm318_vm11, -inf, %v285_v14 }
  0x27   : > { %323 = vrot.lane.b32.xlu0 %v320_v16, %s582_s12 }
  0x90   : > { %v291_v20 = vpop.permute.xlu1 %290 }
  0x91   : > { %vm295_vm13 = vcmp.eq.s32.totalorder %v291_v20, %v294_v19 }
  0x92   : > { %vm297_vm14 = vmxor %vm296_vm12, %vm295_vm13 }
  0x93   : > { %vm298_vm15 = vmxor %vm297_vm14, %vm583_vm5 }
  0x95   : > { %v322_v21 = vpop.permute.xlu0 %321 }
  0x96   : > { %v325_v22 = vadd.f32 %v322_v21, %v319_v15 }
  0x98   : > { %vm327_vm0 = vcmp.ge.f32.partialorder %v325_v22, 0.0  ;;  %537 = vrsqrt.f32 %v325_v22  ;;  %vm335_vm4 = vcmp.eq.f32.partialorder %v325_v22, inf  ;;  %v338_v37 = vand.u32 2147483648, %v325_v22 }
  0x99   : > { %v324_v23 = vpop.permute.xlu0 %323  ;;  %vm660_vm1 = vmand %vm327_vm0, %vm298_vm15  ;;  %vm337_vm5 = vcmp.eq.f32.partialorder %v325_v22, 0.0 }
  0x9a   : > { %v326_v24 = vadd.f32 %v324_v23, %v320_v16  ;;  %v489_v28 = vsel %vm660_vm1, 1.0, %v584_v27 }
  0x9c   : > { %vm328_vm2 = vcmp.ge.f32.partialorder %v326_v24, 0.0  ;;  %539 = vrsqrt.f32 %v326_v24  ;;  %vm342_vm6 = vcmp.eq.f32.partialorder %v326_v24, inf  ;;  %v345_v40 = vand.u32 2147483648, %v326_v24 }
  0x9d   : > { %vm664_vm3 = vmand %vm328_vm2, %vm298_vm15  ;;  %vm344_vm7 = vcmp.eq.f32.partialorder %v326_v24, 0.0 }
  0x9e   : > { %v490_v30 = vsel %vm664_vm3, 1.0, %v584_v27 }
  0x9f   : > { %v358_v31 = vadd.f32 %v490_v30, %v489_v28 }
  0xa1   : > { %v359_v32 = vadd.f32 %v358_v31, %v353_v29 }
  0xa3   : > { %360 = vst [vmem:[%s646_s29] sm:$0xff] %v359_v32 }
  0xa5   : > { %v538_v33 = vpop.eup %537 }
  0xa6   : > { %v334_v34 = vmul.f32 %v538_v33, %v325_v22 }
  0xa8   : > { %v336_v35 = vsel %vm335_vm4, %v325_v22, %v334_v34 }
  0xa9   : > { %v540_v36 = vpop.eup %539  ;;  %v339_v39 = vsel %vm337_vm5, %v338_v37, %v336_v35 }
  0xaa   : > { %v341_v38 = vmul.f32 %v540_v36, %v326_v24  ;;  %v347_v43 = vsel %vm660_vm1, %v339_v39, 0.0 }
  0xac   : > { %v343_v41 = vsel %vm342_vm6, %v326_v24, %v341_v38 }
  0xad   : > { %v346_v42 = vsel %vm344_vm7, %v345_v40, %v343_v41 }
  0xae   : > { %v348_v45 = vsel %vm664_vm3, %v346_v42, 0.0 }
  0xaf   : > { %v350_v46 = vadd.f32 %v348_v45, %v347_v43 }
  0xb1   : > { %v351_v47 = vadd.f32 %v350_v46, %v349_v44 }
  0xb3   : > { %352 = vst [vmem:[%s641_s26] sm:$0xff] %v351_v47 }
  0xb4 PF: > { %s14_s16 = sadd.s32 1, %s579_s16   ;;  %s703_s12 = smov %s571_s14 }
  0xb5   : > { %p11_p9 = scmp.ge.s32.totalorder %s14_s16, 6   ;;  %s704_s13 = smov %s575_s15 }
  0xb6   : > { %s705_s14 = smov %s708_s17  ;;  %s706_s15 = smov %s712_s18 }
  0xb7   :  { %13 = sbr.rel (!%p11_p9) target bundleno = 3 (0x3), region = 77 }

</bundles_post_ra>
